<compile_context>
chip_gen: v5e
topology: v5e:2x2
jax: 0.10.0
libtpu: 0.0.40
codegen_flags: <defaults>
</compile_context>

<pallas_src>
import functools

import jax
import jax.numpy as jnp
from jax.experimental import pallas as pl
from jax.experimental.pallas import tpu as pltpu

LANES = 128      # lane width / lane-padded class dimension
SUM_ROWS = 8     # sublane height of the per-tile partial-sum output block


def head_loss_kernel(cls_ref, w1_ref, b1_ref, w2_ref, b2_ref, lab_ref, out_ref,
                     *, num_classes, batch):
    tb = cls_ref.shape[0]          # batch tile
    cp = w2_ref.shape[1]           # lane-padded class dim (128)

    # MLPLayer: tanh(cls @ W1 + b1).  bf16 MXU inputs, f32 accumulation,
    # f32 tanh (v5e has no bf16 EUP).
    h = jnp.tanh(
        jnp.dot(cls_ref[...].astype(jnp.bfloat16), w1_ref[...],
                preferred_element_type=jnp.float32)
        + b1_ref[...])                                              # [tb, H] f32

    # Classifier: Linear(H, 3), zero-padded to cp lanes; bf16 MXU, f32 acc.
    raw = (jnp.dot(h.astype(jnp.bfloat16), w2_ref[...],
                   preferred_element_type=jnp.float32)
           + b2_ref[...])                                           # [tb, cp]

    col = jax.lax.broadcasted_iota(jnp.int32, (tb, cp), 1)
    valid_col = col < num_classes

    # softmax over the real classes only (padded columns -> exp(-inf) = 0).
    raw_m = jnp.where(valid_col, raw, -jnp.inf)
    m = jnp.max(raw_m, axis=-1, keepdims=True)
    e = jnp.exp(raw_m - m)
    p = e / jnp.sum(e, axis=-1, keepdims=True)                      # exact recip

    # F.cross_entropy applied to the already-softmaxed probabilities (this is
    # exactly what the PyTorch code does):
    #     loss_b = logsumexp_c(p[b, c]) - p[b, label_b]
    ep = jnp.where(valid_col, jnp.exp(p), 0.0)
    lse = jnp.log(jnp.sum(ep, axis=-1, keepdims=True))              # [tb, 1]
    p_label = jnp.sum(jnp.where(col == lab_ref[...], p, 0.0),
                      axis=-1, keepdims=True)                       # [tb, 1]
    per_example = lse - p_label                                     # [tb, 1]

    # Mask batch-overhang rows of the (possibly ragged) last tile, reduce to a
    # per-tile partial sum, and store it as a full, unmasked (8, 128) tile.
    row = jax.lax.broadcasted_iota(jnp.int32, (tb, 1), 0)
    valid_row = (pl.program_id(0) * tb + row) < batch
    tile_sum = jnp.sum(jnp.where(valid_row, per_example, 0.0))
    out_ref[...] = jnp.full(out_ref.shape, tile_sum, dtype=out_ref.dtype)


def _pick_block_b(batch):
    """Batch tile: large enough to feed the MXU and amortize per-step overhead,
    a multiple of 8 (f32 sublane), and yielding >= 2 grid steps whenever the
    batch allows (so v7x's two TensorCores both get work)."""
    padded8 = -(-batch // 8) * 8
    if padded8 <= 8:
        return 8
    if padded8 <= 512:
        half = (-(-(padded8 // 2) // 8)) * 8
        return max(8, min(half, 256))
    return 256


def prepare_params(params):
    """One-time weight prep, called OUTSIDE the jitted step: bf16 W1/W2 and a
    lane-padded (128-wide) classifier, so the per-call wrapper adds no extra
    HBM passes over the weights."""
    w1, b1, w2, b2 = params
    hidden = w1.shape[0]
    num_classes = w2.shape[1]
    assert num_classes <= LANES
    w1_bf16 = w1.astype(jnp.bfloat16)
    b1_2d = b1.reshape(1, hidden).astype(jnp.float32)
    w2_pad = jnp.pad(w2.astype(jnp.bfloat16),
                     ((0, 0), (0, LANES - num_classes)))
    b2_pad = jnp.pad(b2.reshape(1, num_classes).astype(jnp.float32),
                     ((0, 0), (0, LANES - num_classes)))
    return w1_bf16, b1_2d, w2_pad, b2_pad


def model_forward_loss(last_hidden_state, labels, prepared_params, *,
                       num_classes=3):
    """Scalar training loss for Model.forward(..., inference=False) on the
    non-confactual, pool_type='cls' path."""
    w1_bf16, b1, w2_pad, b2_pad = prepared_params
    batch = last_hidden_state.shape[0]
    hidden = last_hidden_state.shape[-1]

    block_b = _pick_block_b(batch)
    nb = -(-batch // block_b)

    # CLS pooling in the wrapper: only the [B, H] CLS rows (not [B, S, H])
    # ever reach the kernel.  No batch padding: ragged tiles masked in-kernel.
    cls = last_hidden_state[:, 0, :]
    labels2d = labels.reshape(batch, 1).astype(jnp.int32)

    kernel = functools.partial(head_loss_kernel,
                               num_classes=num_classes, batch=batch)
    tile_sums = pl.pallas_call(
        kernel,
        grid=(nb,),
        in_specs=[
            pl.BlockSpec((block_b, hidden), lambda i: (i, 0)),   # CLS rows
            pl.BlockSpec((hidden, hidden), lambda i: (0, 0)),    # W1 (bf16)
            pl.BlockSpec((1, hidden), lambda i: (0, 0)),         # b1 (f32)
            pl.BlockSpec((hidden, LANES), lambda i: (0, 0)),     # W2 (bf16, pad)
            pl.BlockSpec((1, LANES), lambda i: (0, 0)),          # b2 (f32, pad)
            pl.BlockSpec((block_b, 1), lambda i: (i, 0)),        # labels int32
        ],
        out_specs=pl.BlockSpec((SUM_ROWS, LANES), lambda i: (i, 0)),
        out_shape=jax.ShapeDtypeStruct((nb * SUM_ROWS, LANES), jnp.float32),
        compiler_params=pltpu.CompilerParams(
            dimension_semantics=("parallel",)),
    )(cls, w1_bf16, b1, w2_pad, b2_pad, labels2d)

    # Each tile broadcast-stored its partial sum; pick one element per tile.
    partial = tile_sums.reshape(nb, SUM_ROWS, LANES)[:, 0, 0]
    return jnp.sum(partial) / batch


def reference_forward_loss(last_hidden_state, labels, params):
    """Pure-JAX f32 reference implementing the exact PyTorch semantics."""
    w1, b1, w2, b2 = params
    cls = last_hidden_state[:, 0, :]
    h = jnp.tanh(cls @ w1 + b1)
    raw = h @ w2 + b2
    p = jax.nn.softmax(raw, axis=-1)
    logp = jax.nn.log_softmax(p, axis=-1)
    onehot = jax.nn.one_hot(labels, w2.shape[1], dtype=jnp.float32)
    return jnp.mean(-jnp.sum(onehot * logp, axis=-1))


def init_params(key, hidden_size, num_classes):
    """nn.Linear-style init (uniform +-1/sqrt(fan_in)); weights stored [in, out]
    (transposed vs. torch) so the forward pass is x @ W."""
    k1, k2, k3, k4 = jax.random.split(key, 4)
    lim = 1.0 / jnp.sqrt(hidden_size)
    w1 = jax.random.uniform(k1, (hidden_size, hidden_size), jnp.float32, -lim, lim)
    b1 = jax.random.uniform(k2, (1, hidden_size), jnp.float32, -lim, lim)
    w2 = jax.random.uniform(k3, (hidden_size, num_classes), jnp.float32, -lim, lim)
    b2 = jax.random.uniform(k4, (1, num_classes), jnp.float32, -lim, lim)
    return w1, b1, w2, b2


if __name__ == "__main__":
    B, S, H, C = 16, 8, 128, 3     # batch, seq, hidden, num_classes (small demo)

    key = jax.random.PRNGKey(0)
    k_hid, k_lab, k_par = jax.random.split(key, 3)

    # Synthetic stand-in for bert(...).last_hidden_state.
    last_hidden_state = jax.random.normal(k_hid, (B, S, H), dtype=jnp.float32)
    labels = jax.random.randint(k_lab, (B,), 0, C, dtype=jnp.int32)
    params = init_params(k_par, H, C)

    # One-time weight prep (bf16 cast + lane padding) outside the jitted step.
    prepared = jax.block_until_ready(prepare_params(params))

    step = jax.jit(functools.partial(model_forward_loss, num_classes=C))
    loss = jax.block_until_ready(step(last_hidden_state, labels, prepared))
    ref = jax.block_until_ready(
        reference_forward_loss(last_hidden_state, labels, params))

    # Tolerance accounts for the deliberate low-precision choices in the kernel
    # (bf16 matmul inputs with f32 accumulation); the reference is strict f32.
    assert jnp.isfinite(loss), "loss is not finite"
    assert jnp.allclose(loss, ref, rtol=2e-2, atol=2e-2), (loss, ref)
    print("KERNEL_OK")
</pallas_src>

<mosaic_0001>
module attributes {stable_mosaic.version = 11 : i64} {
  func.func @head_loss_kernel(%arg0: i32, %arg1: memref<8x128xf32, #tpu.memory_space<vmem>>, %arg2: memref<128x128xbf16, #tpu.memory_space<vmem>>, %arg3: memref<1x128xf32, #tpu.memory_space<vmem>>, %arg4: memref<128x128xbf16, #tpu.memory_space<vmem>>, %arg5: memref<1x128xf32, #tpu.memory_space<vmem>>, %arg6: memref<8x1xi32, #tpu.memory_space<vmem>>, %arg7: memref<8x128xf32, #tpu.memory_space<vmem>>) attributes {dimension_semantics = [#tpu.dimension_semantics<parallel>], iteration_bounds = array<i64: 2>, scalar_prefetch = 0 : i64, scratch_operands = 0 : i64, tpu.core_type = #tpu.core_type<tc>, window_params = [{transform_indices = @transform_0, window_bounds = array<i64: 8, 128>}, {pipeline_mode = #tpu.pipeline_mode<synchronous>, transform_indices = @transform_1, window_bounds = array<i64: 128, 128>}, {pipeline_mode = #tpu.pipeline_mode<synchronous>, transform_indices = @transform_2, window_bounds = array<i64: 1, 128>}, {pipeline_mode = #tpu.pipeline_mode<synchronous>, transform_indices = @transform_3, window_bounds = array<i64: 128, 128>}, {pipeline_mode = #tpu.pipeline_mode<synchronous>, transform_indices = @transform_4, window_bounds = array<i64: 1, 128>}, {transform_indices = @transform_5, window_bounds = array<i64: 8, 1>}, {transform_indices = @transform_6, window_bounds = array<i64: 8, 128>}]} {
    %c0 = arith.constant 0 : index
    %c0_0 = arith.constant 0 : index
    %0 = vector.load %arg1[%c0, %c0_0] : memref<8x128xf32, #tpu.memory_space<vmem>>, vector<8x128xf32>
    %1 = arith.truncf %0 : vector<8x128xf32> to vector<8x128xbf16>
    %c0_1 = arith.constant 0 : index
    %c0_2 = arith.constant 0 : index
    %2 = vector.load %arg2[%c0_1, %c0_2] : memref<128x128xbf16, #tpu.memory_space<vmem>>, vector<128x128xbf16>
    %cst = arith.constant dense<0.000000e+00> : vector<8x128xf32>
    %3 = tpu.matmul %1, %2, %cst {dimension_numbers = #tpu.dot_dimension_numbers<[1], [0], [0], [1], [0, 0, 1, 1], [], []>} : vector<8x128xbf16>, vector<128x128xbf16>, vector<8x128xf32> -> vector<8x128xf32>
    %c0_3 = arith.constant 0 : index
    %c0_4 = arith.constant 0 : index
    %4 = vector.load %arg3[%c0_3, %c0_4] : memref<1x128xf32, #tpu.memory_space<vmem>>, vector<1x128xf32>
    %5 = vector.broadcast %4 : vector<1x128xf32> to vector<8x128xf32>
    %6 = arith.addf %3, %5 : vector<8x128xf32>
    %7 = math.tanh %6 : vector<8x128xf32>
    %8 = arith.truncf %7 : vector<8x128xf32> to vector<8x128xbf16>
    %c0_5 = arith.constant 0 : index
    %c0_6 = arith.constant 0 : index
    %9 = vector.load %arg4[%c0_5, %c0_6] : memref<128x128xbf16, #tpu.memory_space<vmem>>, vector<128x128xbf16>
    %cst_7 = arith.constant dense<0.000000e+00> : vector<8x128xf32>
    %10 = tpu.matmul %8, %9, %cst_7 {dimension_numbers = #tpu.dot_dimension_numbers<[1], [0], [0], [1], [0, 0, 1, 1], [], []>} : vector<8x128xbf16>, vector<128x128xbf16>, vector<8x128xf32> -> vector<8x128xf32>
    %c0_8 = arith.constant 0 : index
    %c0_9 = arith.constant 0 : index
    %11 = vector.load %arg5[%c0_8, %c0_9] : memref<1x128xf32, #tpu.memory_space<vmem>>, vector<1x128xf32>
    %12 = vector.broadcast %11 : vector<1x128xf32> to vector<8x128xf32>
    %13 = arith.addf %10, %12 : vector<8x128xf32>
    %14 = tpu.iota {dimensions = array<i32: 1>} : vector<8x128xi32>
    %c3_i32 = arith.constant 3 : i32
    %15 = vector.broadcast %c3_i32 : i32 to vector<8x128xi32>
    %16 = arith.cmpi slt, %14, %15 : vector<8x128xi32>
    %cst_10 = arith.constant 0xFF800000 : f32
    %17 = vector.broadcast %cst_10 : f32 to vector<8x128xf32>
    %18 = arith.select %16, %13, %17 : vector<8x128xi1>, vector<8x128xf32>
    %cst_11 = arith.constant dense<0xFF800000> : vector<8xf32>
    %19 = vector.multi_reduction <maximumf>, %18, %cst_11 [1] : vector<8x128xf32> to vector<8xf32>
    %20 = vector.shape_cast %19 : vector<8xf32> to vector<8x1xf32>
    %21 = vector.broadcast %20 : vector<8x1xf32> to vector<8x128xf32>
    %22 = arith.subf %18, %21 : vector<8x128xf32>
    %23 = math.exp %22 : vector<8x128xf32>
    %cst_12 = arith.constant dense<0.000000e+00> : vector<8xf32>
    %24 = vector.multi_reduction <add>, %23, %cst_12 [1] : vector<8x128xf32> to vector<8xf32>
    %25 = vector.shape_cast %24 : vector<8xf32> to vector<8x1xf32>
    %26 = vector.broadcast %25 : vector<8x1xf32> to vector<8x128xf32>
    %27 = arith.divf %23, %26 : vector<8x128xf32>
    %28 = math.exp %27 : vector<8x128xf32>
    %cst_13 = arith.constant 0.000000e+00 : f32
    %29 = vector.broadcast %cst_13 : f32 to vector<8x128xf32>
    %30 = arith.select %16, %28, %29 : vector<8x128xi1>, vector<8x128xf32>
    %cst_14 = arith.constant dense<0.000000e+00> : vector<8xf32>
    %31 = vector.multi_reduction <add>, %30, %cst_14 [1] : vector<8x128xf32> to vector<8xf32>
    %32 = vector.shape_cast %31 : vector<8xf32> to vector<8x1xf32>
    %33 = math.log %32 : vector<8x1xf32>
    %c0_15 = arith.constant 0 : index
    %c0_16 = arith.constant 0 : index
    %34 = vector.load %arg6[%c0_15, %c0_16] : memref<8x1xi32, #tpu.memory_space<vmem>>, vector<8x1xi32>
    %35 = vector.broadcast %34 : vector<8x1xi32> to vector<8x128xi32>
    %36 = arith.cmpi eq, %14, %35 : vector<8x128xi32>
    %cst_17 = arith.constant 0.000000e+00 : f32
    %37 = vector.broadcast %cst_17 : f32 to vector<8x128xf32>
    %38 = arith.select %36, %27, %37 : vector<8x128xi1>, vector<8x128xf32>
    %cst_18 = arith.constant dense<0.000000e+00> : vector<8xf32>
    %39 = vector.multi_reduction <add>, %38, %cst_18 [1] : vector<8x128xf32> to vector<8xf32>
    %40 = vector.shape_cast %39 : vector<8xf32> to vector<8x1xf32>
    %41 = arith.subf %33, %40 : vector<8x1xf32>
    %42 = tpu.iota {dimensions = array<i32: 0>} : vector<8x1xi32>
    %c8_i32 = arith.constant 8 : i32
    %43 = arith.muli %arg0, %c8_i32 : i32
    %44 = vector.broadcast %43 : i32 to vector<8x1xi32>
    %45 = arith.addi %44, %42 : vector<8x1xi32>
    %c16_i32 = arith.constant 16 : i32
    %46 = vector.broadcast %c16_i32 : i32 to vector<8x1xi32>
    %47 = arith.cmpi slt, %45, %46 : vector<8x1xi32>
    %cst_19 = arith.constant 0.000000e+00 : f32
    %48 = vector.broadcast %cst_19 : f32 to vector<8x1xf32>
    %49 = arith.select %47, %41, %48 : vector<8x1xi1>, vector<8x1xf32>
    %50 = vector.shape_cast %49 : vector<8x1xf32> to vector<1x8x1xf32>
    %cst_20 = arith.constant dense<0.000000e+00> : vector<1xf32>
    %51 = vector.multi_reduction <add>, %50, %cst_20 [1, 2] : vector<1x8x1xf32> to vector<1xf32>
    %52 = vector.shape_cast %51 : vector<1xf32> to vector<1x1x1xf32>
    %53 = vector.extract %52[0, 0, 0] : f32 from vector<1x1x1xf32>
    %54 = vector.broadcast %53 : f32 to vector<8x128xf32>
    %c0_21 = arith.constant 0 : index
    %c0_22 = arith.constant 0 : index
    %55 = vector.load %arg7[%c0_21, %c0_22] : memref<8x128xf32, #tpu.memory_space<vmem>>, vector<8x128xf32>
    tpu.vector_store %arg7[%c0_21, %c0_22], %54 {strides = array<i32>} : memref<8x128xf32, #tpu.memory_space<vmem>>, vector<8x128xf32>,
    return
  }
  func.func @transform_0(%arg0: i32) -> (i32, i32) {
    %c0_i32 = arith.constant 0 : i32
    %c0_i32_0 = arith.constant 0 : i32
    return %arg0, %c0_i32 : i32, i32
  }
  func.func @transform_1(%arg0: i32) -> (i32, i32) {
    %c0_i32 = arith.constant 0 : i32
    %c0_i32_0 = arith.constant 0 : i32
    %c0_i32_1 = arith.constant 0 : i32
    return %c0_i32, %c0_i32_0 : i32, i32
  }
  func.func @transform_2(%arg0: i32) -> (i32, i32) {
    %c0_i32 = arith.constant 0 : i32
    %c0_i32_0 = arith.constant 0 : i32
    %c0_i32_1 = arith.constant 0 : i32
    return %c0_i32, %c0_i32_0 : i32, i32
  }
  func.func @transform_3(%arg0: i32) -> (i32, i32) {
    %c0_i32 = arith.constant 0 : i32
    %c0_i32_0 = arith.constant 0 : i32
    %c0_i32_1 = arith.constant 0 : i32
    return %c0_i32, %c0_i32_0 : i32, i32
  }
  func.func @transform_4(%arg0: i32) -> (i32, i32) {
    %c0_i32 = arith.constant 0 : i32
    %c0_i32_0 = arith.constant 0 : i32
    %c0_i32_1 = arith.constant 0 : i32
    return %c0_i32, %c0_i32_0 : i32, i32
  }
  func.func @transform_5(%arg0: i32) -> (i32, i32) {
    %c0_i32 = arith.constant 0 : i32
    %c0_i32_0 = arith.constant 0 : i32
    return %arg0, %c0_i32 : i32, i32
  }
  func.func @transform_6(%arg0: i32) -> (i32, i32) {
    %c0_i32 = arith.constant 0 : i32
    %c0_i32_0 = arith.constant 0 : i32
    return %arg0, %c0_i32 : i32, i32
  }
}

</mosaic_0001>

<bundles_post_ra>
// kernel: model_forward_loss.1
= control target key start
LH: loop header
LB: loop body
LE: loop exit
PB: predicated region body
PF: predicated region fallthrough
CT: control target
= control target key end

     0   :  { %11 = vsyncpa [#allocation3], 0  ;;  %s935_s0 = inlined_call_operand.vmem [shape: f32[16,128], index: 0, kind: input, shape index: {}]   ;;  %s936_s1 = inlined_call_operand.hbm [shape: bf16[128,128], index: 1, kind: input, shape index: {}]   ;;  %s937_s2 = inlined_call_operand.vmem [shape: f32[1,128], index: 2, kind: input, shape index: {}]   ;;  %s938_s3 = inlined_call_operand.hbm [shape: bf16[128,128], index: 3, kind: input, shape index: {}]   ;;  %s939_s4 = inlined_call_operand.vmem [shape: f32[1,128], index: 4, kind: input, shape index: {}]   ;;  %s940_s5 = inlined_call_operand.vmem [shape: s32[16,1], index: 5, kind: input, shape index: {}]   ;;  %s941_s6 = inlined_call_operand.vmem [shape: f32[16,128], index: 6, kind: output, shape index: {}]  }
   0x1   :  { %12 = vsyncpa [#allocation5], 0  ;;  %s872_s21 = smov 0  }
   0x2 LB: > { %s196_s24 = sshll.u32 %s936_s1, 4  ;;  %s881_s25 = sadd.s32 4294967295, %s830_s21   ;;  %s830_s21 = sphi %s872_s21, %s18_s21   ;;  %s197_s24 = int_to_ptr.hbm [resolvable:$true] %s196_s24 }
   0x3   : > { %p615_p0 = scmp.ge.s32.totalorder %s830_s21, 1  ;;  %p185_p1 = scmp.lt.s32.totalorder %s830_s21, 3 }
   0x4   : > { %p725_p2 = scmp.eq.s32.totalorder %s881_s25, 0  ;;  %s832_s27 = smov [#allocation2]  }
   0x5   : > { %p886_p3 = pnand %p615_p0, %p185_p1  ;;  %s198_s28 = sshll.u32 %s832_s27, 4  ;;  %s199_s28 = int_to_ptr.vmem [resolvable:$true] %s198_s28 }
   0x6   : > { %s213_s7 = sshll.u32 %s938_s3, 4  ;;  %s833_s8 = smov [#allocation4]   ;;  %s214_s7 = int_to_ptr.hbm [resolvable:$true] %s213_s7 }
   0x7   : > { %p718_p4 = pneg %p886_p3  ;;  %s215_s9 = sshll.u32 %s833_s8, 4  ;;  %s216_s9 = int_to_ptr.vmem [resolvable:$true] %s215_s9 }
   0x8   : > { %s834_s10 = smov 64   ;;  %s835_s11 = smov 4  }
   0x9   : > { %p719_p5 = pnand %p725_p2, %p718_p4  ;;  %248 = sbr.rel (%p886_p3) target bundleno = 896 (0x380), region = 44 }
   0xb   : > { %721 = dma.hbm_to_vmem [thread:$0]  (!%p719_p5), %s197_s24, 1024, %s199_s28, [#allocation3], %s834_s10, %s834_s10, %s835_s11  }
   0xc   : > { %724 = dma.hbm_to_vmem [thread:$0]  (!%p719_p5), %s214_s7, 1024, %s216_s9, [#allocation5], %s834_s10, %s834_s10, %s835_s11  }
   0xe   : > { %821 = dma.done.wait (%p725_p2), [#allocation3], 1024  }
   0xf   : > { %823 = vsyncadd (%p725_p2), [#allocation3], 4294966272 }
  0x10   : > { %825 = dma.done.wait (%p725_p2), [#allocation5], 1024  }
  0x11   : > { %827 = vsyncadd (%p725_p2), [#allocation5], 4294966272  ;;  %v699_v0 = vld [vmem:[#allocation2 + $0x38] sm:$0xff]  ;;  %v698_v1 = vld [vmem:[#allocation2 + $0x30] sm:$0xff]  ;;  %p286_p6 = scmp.lt.s32.totalorder %s881_s25, 1  ;;  %v464_v24 = vlaneseq  ;;  %v836_v32 = vmov 0  }
  0x12   : > { %368 = vmatpush.bf16.msra.mxu0 %v699_v0  ;;  %v707_v2 = vld [vmem:[#allocation4 + $0x38] sm:$0xff]  ;;  %v706_v3 = vld [vmem:[#allocation4 + $0x30] sm:$0xff]  ;;  %v697_v4 = vld [vmem:[#allocation2 + $0x28] sm:$0xff]  ;;  %742 = vset.pattern.permute.xlu1 %v836_v32  ;;  %s689_s26 = sshll.u32 %s881_s25, 3  ;;  %vm513_vm7 = vcmask 7168  }
  0x13   : > { %451 = vmatpush.bf16.msra.mxu1 %v707_v2  ;;  %v705_v5 = vld [vmem:[#allocation4 + $0x28] sm:$0xff]  ;;  %v696_v6 = vld [vmem:[#allocation2 + $0x20] sm:$0xff]  ;;  %v695_v8 = vld [vmem:[#allocation2 + $0x18] sm:$0xff]  ;;  %s287_s12 = scalar_select %p286_p6, %s881_s25, 1  ;;  %v465_v25 = vand.u32 127, %v464_v24  ;;  %743 = vset.pattern.permute.xlu0 %v836_v32  ;;  %v507_v55 = vshrl.u32 %v464_v24, 7  ;;  %v509_v56 = vstv %s689_s26 }
  0x14   : > { %v704_v7 = vld [vmem:[#allocation4 + $0x20] sm:$0xff]  ;;  %v703_v9 = vld [vmem:[#allocation4 + $0x18] sm:$0xff]  ;;  %v694_v10 = vld [vmem:[#allocation2 + $0x10] sm:$0xff] }
  0x15   : > { %s909_s13 = sshll.u32 %s287_s12, 3  ;;  %v693_v11 = vld [vmem:[#allocation2 + $0x8] sm:$0xff]  ;;  %v692_v12 = vld [vmem:[#allocation2] sm:$0xff]  ;;  %v702_v15 = vld [vmem:[#allocation4 + $0x10] sm:$0xff]  ;;  %vm466_vm0 = vcmp.lt.s32.totalorder %v465_v25, 3  ;;  %v510_v57 = vadd.s32 %v509_v56, %v507_v55 }
  0x16   : > { %369 = vmatpush.bf16.msra.mxu0 %v698_v1  ;;  %s289_s16 = scalar_lea.vmem %s935_s0, %s909_s13  ;;  %v701_v16 = vld [vmem:[#allocation4 + $0x8] sm:$0xff]  ;;  %v700_v17 = vld [vmem:[#allocation4] sm:$0xff]  ;;  %s293_s24 = scalar_lea.vmem %s940_s5, %s909_s13 }
  0x17   : > { %452 = vmatpush.bf16.msra.mxu1 %v706_v3  ;;  %v298_v13 = vld [vmem:[%s289_s16] sm:$0xff]  ;;  %vm511_vm6 = vcmp.lt.s32.totalorder %v510_v57, 16  ;;  %s297_s28 = scalar_lea.vmem %s941_s6, %s909_s13 }
  0x18   : > { %v299_v14 = vpack.c.bf16 %v298_v13, %v298_v13  ;;  %v744_v18 = vld [vmem:[%s937_s2] ss:$0 sm:$0xff] }
  0x19   : > { %v745_v26 = vld [vmem:[%s939_s4] ss:$0 sm:$0xff] }
  0x1a   : > { %370 = vmatpush.bf16.msra.mxu0 %v697_v4  ;;  %v497_v31 = vld [vmem:[%s293_s24] sm:$0xff] }
  0x1b   : > { %453 = vmatpush.bf16.msra.mxu1 %v705_v5  ;;  %499 = vperm.xlu1 %742, %v497_v31  }
  0x1e   : > { %371 = vmatpush.bf16.msra.mxu0 %v696_v6 }
  0x1f   : > { %454 = vmatpush.bf16.msra.mxu1 %v704_v7 }
  0x22   : > { %372 = vmatpush.bf16.msra.mxu0 %v695_v8 }
  0x23   : > { %455 = vmatpush.bf16.msra.mxu1 %v703_v9 }
  0x26   : > { %373 = vmatpush.bf16.msra.mxu0 %v694_v10 }
  0x27   : > { %456 = vmatpush.bf16.msra.mxu1 %v702_v15 }
  0x2a   : > { %374 = vmatpush.bf16.msra.mxu0 %v693_v11 }
  0x2b   : > { %457 = vmatpush.bf16.msra.mxu1 %v701_v16 }
  0x2e   : > { %375 = vmatpush.bf16.msra.mxu0 %v692_v12 }
  0x2f   : > { %458 = vmatpush.bf16.msra.mxu1 %v700_v17 }
  0x31   : > { %376 = vmatmul.bf16.vlgmr.msra.gmra.mxu0 %v299_v14 }
  0x8d   : > { %v500_v44 = vpop.permute.xlu1 %499 }
  0x8e   : > { %vm501_vm5 = vcmp.eq.s32.totalorder %v465_v25, %v500_v44 }
  0xae   : > { %v377_v19 = vpop.f32.mrf.mxu0 }
  0xaf   : > { %v378_v20 = vadd.f32 %v744_v18, %v377_v19 }
  0xb1   : > { %746 = vtanh.f32 %v378_v20 }
  0xb6   : > { %v379_v21 = vpop.f32.mrf.mxu0 }
  0xb7   : > { %v747_v22 = vpop.eup %746 }
  0xb8   : > { %v382_v23 = vpack.c.bf16 %v747_v22, %v747_v22 }
  0xba   : > { %459 = vmatmul.bf16.vlgmr.msra.gmra.mxu1 %v382_v23 }
 0x137   : > { %v460_v27 = vpop.f32.mrf.mxu1 }
 0x138   : > { %v461_v28 = vadd.f32 %v745_v26, %v460_v27 }
 0x13a   : > { %v467_v29 = vsel %vm466_vm0, %v461_v28, -inf }
 0x13b   : > { %468 = vmax.xlane.f32.xlu0 %v467_v29 }
 0x13f   : > { %v462_v30 = vpop.f32.mrf.mxu1 }
 0x1ae   : > { %v469_v33 = vpop.xlane.xlu0 %468 }
 0x1af   : > { %v470_v34 = vsub.f32 %v467_v29, %v469_v33 }
 0x1b1   : > { %v471_v35 = vmul.f32 1.442695, %v470_v34 }
 0x1b3   : > { %748 = vpow2.f32 %v471_v35 }
 0x1b9   : > { %v749_v36 = vpop.eup %748 }
 0x1ba   : > { %473 = vadd.xlane.f32.xlu0 %v749_v36 }
 0x22d   : > { %v474_v37 = vpop.xlane.xlu0 %473 }
 0x22e   : > { %750 = vrcp.f32 %v474_v37  ;;  %v486_v41 = vand.u32 2147483648, %v474_v37  ;;  %v484_v43 = vand.u32 2147483647, %v474_v37  ;;  %vm480_vm2 = vweird.f32 %v474_v37 }
 0x230   : > { %v487_v46 = vor.u32 1.1754944e-38, %v486_v41  ;;  %vm485_vm4 = vcmp.eq.f32.partialorder %v484_v43, 8.507059e+37 }
 0x234   : > { %v751_v38 = vpop.eup %750 }
 0x235   : > { %v476_v39 = vmul.f32 %v751_v38, %v474_v37  ;;  %vm481_vm1 = vweird.f32 %v751_v38 }
 0x236   : > { %vm482_vm3 = vmor %vm480_vm2, %vm481_vm1 }
 0x237   : > { %v477_v40 = vsub.f32 1.0, %v476_v39 }
 0x239   : > { %v478_v42 = vmul.f32 %v751_v38, %v477_v40 }
 0x23b   : > { %v479_v45 = vadd.f32 %v751_v38, %v478_v42 }
 0x23d   : > { %v483_v47 = vsel %vm482_vm3, %v751_v38, %v479_v45 }
 0x23e   : > { %v488_v48 = vsel %vm485_vm4, %v487_v46, %v483_v47 }
 0x23f   : > { %v489_v49 = vmul.f32 %v749_v36, %v488_v48 }
 0x241   : > { %v502_v50 = vsel %vm501_vm5, %v489_v49, 0.0  ;;  %v490_v51 = vmul.f32 1.442695, %v489_v49 }
 0x242   : > { %503 = vadd.xlane.f32.xlu2 %v502_v50 }
 0x243   : > { %752 = vpow2.f32 %v490_v51 }
 0x249   : > { %v753_v52 = vpop.eup %752 }
 0x24a   : > { %v492_v53 = vsel %vm466_vm0, %v753_v52, 0.0 }
 0x24b   : > { %493 = vadd.xlane.f32.xlu1 %v492_v53 }
 0x2b5   : > { %v504_v60 = vpop.xlane.xlu2 %503 }
 0x2be   : > { %v494_v54 = vpop.xlane.xlu1 %493 }
 0x2bf   : > { %754 = vlog2.f32 %v494_v54 }
 0x2c5   : > { %v755_v58 = vpop.eup %754 }
 0x2c6   : > { %v496_v59 = vmul.f32 0.6931472, %v755_v58 }
 0x2c8   : > { %v505_v61 = vsub.f32 %v496_v59, %v504_v60 }
 0x2ca   : > { %v512_v62 = vsel %vm511_vm6, %v505_v61, 0.0 }
 0x2cb   : > { %v514_v63 = vsel %vm513_vm7, %v512_v62, 0.0 }
 0x2cc   : > { %515 = vadd.xlane.f32.xlu2 %v514_v63 }
 0x33f   : > { %v516_v0 = vpop.xlane.xlu2 %515 }
 0x340   : > { %v517_v1 = vrot.slane %v516_v0, 4 }
 0x342   : > { %v518_v2 = vadd.f32 %v517_v1, %v516_v0 }
 0x344   : > { %v519_v3 = vrot.slane %v518_v2, 2 }
 0x346   : > { %v520_v4 = vadd.f32 %v519_v3, %v518_v2 }
 0x348   : > { %v521_v5 = vrot.slane %v520_v4, 1 }
 0x34a   : > { %v522_v6 = vadd.f32 %v521_v5, %v520_v4 }
 0x34c   : > { %708 = vpush %v522_v6 }
 0x37d   : > { %s709_s29 = spop %708 }
 0x37e   : > { %v524_v7 = vstv %s709_s29 }
 0x37f   : > { %525 = vst [vmem:[%s297_s28] sm:$0xff] %v524_v7 }
 0x380 PF: > { %s18_s21 = sadd.s32 1, %s830_s21  }
 0x381   : > { %p15_p7 = scmp.ge.s32.totalorder %s18_s21, 4  }
 0x383   :  { %17 = sbr.rel (!%p15_p7) target bundleno = 2 (0x2), region = 86 }
 0x388   :  { %545 = vsyncpa [#allocation3], 1 }
 0x389   :  { %547 = vsyncpa [#allocation3 + $0x1], 1 }
 0x38a   :  { %548 = vsyncpa [#allocation5], 1 }

</bundles_post_ra>
